<compile_context>
chip_gen: v7x
topology: tpu7x:2x2x1
jax: 0.10.0
libtpu: 0.0.40
codegen_flags: <defaults>
</compile_context>

<pallas_src>
import jax
import jax.numpy as jnp
from jax.experimental import pallas as pl
from jax.experimental.pallas import tpu as pltpu


def _softplus(x):
    # Numerically stable softplus, matches torch.nn.Softplus (beta=1, threshold=20).
    return jnp.where(x > 20.0, x, jnp.log1p(jnp.exp(jnp.minimum(x, 20.0))))


def planar_kernel(zk_ref, u_ref, w_ref, b_ref, z_out_ref, ldj_out_ref):
    zk = zk_ref[...].astype(jnp.float32)   # (TB, Z)
    u = u_ref[...].astype(jnp.float32)     # (TB, Z)
    w = w_ref[...].astype(jnp.float32)     # (TB, Z)
    b = b_ref[...].astype(jnp.float32)     # (TB, 1)

    # Per-batch dot products -> (TB, 1) lane reductions.
    uw = jnp.sum(w * u, axis=-1, keepdims=True)            # w . u
    # Clamp ||w||^2 away from 0 so garbage rows of a ragged last block never divide
    # by zero (those rows are masked on store / sliced off in the wrapper anyway).
    w_norm_sq = jnp.maximum(jnp.sum(w * w, axis=-1, keepdims=True), 1e-30)
    m_uw = -1.0 + _softplus(uw)

    # u_hat = u + (m(uw) - uw) * w / ||w||^2
    # Fold the division into a per-batch (TB,1) reciprocal instead of a (TB,Z) divide.
    coef = (m_uw - uw) * pl.reciprocal(w_norm_sq, approx=False)   # (TB, 1)
    u_hat = u + coef * w                                          # (TB, Z)

    # wzb = w . zk + b   -> (TB, 1)
    wzb = jnp.sum(w * zk, axis=-1, keepdims=True) + b
    h_wzb = jnp.tanh(wzb)                  # (TB, 1)
    der_h = 1.0 - h_wzb * h_wzb            # (TB, 1)

    # z' = z + u_hat * tanh(w^T z + b)
    z_out_ref[...] = (zk + u_hat * h_wzb).astype(z_out_ref.dtype)

    # psi . u_hat = h'(wzb) * (w . u_hat) = h'(wzb) * m(uw)   (exact identity)
    ldj_col = jnp.log(jnp.abs(1.0 + der_h * m_uw))               # (TB, 1) f32
    # Lane-dense store: relayout the per-row column to a lane-major row (XLU has slack;
    # same sublane->lane pattern as the flash-attention LSE output).
    ldj_out_ref[0, 0, :] = ldj_col[:, 0].astype(ldj_out_ref.dtype)


def _round_up(x, m):
    return ((x + m - 1) // m) * m


def _round_down(x, m):
    return (x // m) * m


def _physical_vmem_bytes():
    try:
        cap = getattr(pltpu.get_tpu_info(), "vmem_capacity_bytes", None)
        if cap:
            return int(cap)
    except Exception:
        pass
    return 64 * 1024 * 1024   # conservative fallback: assume v7x-sized (64 MiB) VMEM


def _pick_tile_b(B, Z, itemsize):
    """Pick TILE_B and the scoped-VMEM limit from lane-padded VMEM accounting."""
    phys = _physical_vmem_bytes()
    # v7x (64 MiB physical): limit ~48 MiB.  v5e/v6e (128 MiB): limit ~96 MiB.
    vmem_limit = min(phys * 3 // 4, 96 * 1024 * 1024)
    budget = int(vmem_limit * 0.80)          # headroom within the scoped limit

    # Lane-padded VMEM bytes per batch row.
    z_pad = _round_up(Z, 128)
    in_row = 3 * z_pad * itemsize + 128 * itemsize     # zk, u, w blocks + b block
    out_row = z_pad * itemsize + 8 * 4                 # z block + lane-dense f32 ldj block
    f32_row = 4 * z_pad * 4                            # headroom for f32 intermediates
    bytes_per_row = 2 * (in_row + out_row) + f32_row   # x2: double-buffered pipeline

    tile_b = budget // max(bytes_per_row, 1)
    tile_b = max(8, min(tile_b, 16384))                # keep per-step work in 4k-16k rows

    # Keep >= 2-4 grid steps once the batch is big enough (pipelining + v7x megacore).
    min_tile = 1024
    if B >= 4 * min_tile:
        tile_b = min(tile_b, _round_up(pl.cdiv(B, 4), 8))
    elif B >= 2 * min_tile:
        tile_b = min(tile_b, _round_up(pl.cdiv(B, 2), 8))

    if tile_b >= B:
        # Small batch: one full-array block (block dims == array dims is always legal).
        return B, vmem_limit
    return max(_round_down(tile_b, 8), 8), vmem_limit


def planar_forward(zk, u, w, b):
    """zk: (B,Z), u: (B,Z,1), w: (B,1,Z), b: (B,1,1) -> (z: (B,Z), ldj: (B,) f32)."""
    B, Z = zk.shape
    dtype = zk.dtype
    itemsize = jnp.dtype(dtype).itemsize

    u2 = u.reshape(B, Z)   # (B, Z, 1) -> (B, Z)   (free, contiguous)
    w2 = w.reshape(B, Z)   # (B, 1, Z) -> (B, Z)   (free, contiguous)
    b2 = b.reshape(B, 1)   # (B, 1, 1) -> (B, 1)

    tile_b, vmem_limit = _pick_tile_b(B, Z, itemsize)
    num_tiles = pl.cdiv(B, tile_b)   # ragged last block handled in-kernel (no jnp.pad)

    cost = pl.CostEstimate(
        flops=10 * B * Z,
        transcendentals=5 * B,
        bytes_accessed=(4 * B * Z + B) * itemsize + B * 4,
    )

    z_out, ldj_out = pl.pallas_call(
        planar_kernel,
        out_shape=(
            jax.ShapeDtypeStruct((B, Z), dtype),
            # Lane-dense log-det: one full row of TILE_B values per grid step.
            jax.ShapeDtypeStruct((num_tiles, 1, tile_b), jnp.float32),
        ),
        grid=(num_tiles,),
        in_specs=[
            pl.BlockSpec((tile_b, Z), lambda i: (i, 0)),
            pl.BlockSpec((tile_b, Z), lambda i: (i, 0)),
            pl.BlockSpec((tile_b, Z), lambda i: (i, 0)),
            pl.BlockSpec((tile_b, 1), lambda i: (i, 0)),
        ],
        out_specs=(
            pl.BlockSpec((tile_b, Z), lambda i: (i, 0)),
            pl.BlockSpec((1, 1, tile_b), lambda i: (i, 0, 0)),
        ),
        compiler_params=pltpu.CompilerParams(
            dimension_semantics=("parallel",),        # megacore sharding on v7x
            vmem_limit_bytes=int(vmem_limit),         # per-generation scoped limit
        ),
        cost_estimate=cost,
    )(zk, u2, w2, b2)

    # (num_tiles, 1, tile_b) -> (num_tiles*tile_b,) is a free row-major reshape; the
    # trailing slice only touches the (tiny) f32 log-det vector, not any (B,Z) array.
    ldj = ldj_out.reshape(num_tiles * tile_b)[:B]
    return z_out, ldj


def planar_reference(zk, u, w, b):
    """Pure-JAX reference mirroring the PyTorch module exactly."""
    zk3 = zk[:, :, None]                                    # (B, Z, 1)
    uw = jnp.einsum("bij,bjk->bik", w, u)                   # (B, 1, 1)
    m_uw = -1.0 + jax.nn.softplus(uw)
    w_norm_sq = jnp.sum(w ** 2, axis=2, keepdims=True)      # (B, 1, 1)
    u_hat = u + (m_uw - uw) * jnp.transpose(w, (0, 2, 1)) / w_norm_sq
    wzb = jnp.einsum("bij,bjk->bik", w, zk3) + b             # (B, 1, 1)
    z = (zk3 + u_hat * jnp.tanh(wzb))[:, :, 0]               # (B, Z)
    psi = w * (1.0 - jnp.tanh(wzb) ** 2)                     # (B, 1, Z)
    ldj = jnp.log(jnp.abs(1 + jnp.einsum("bij,bjk->bik", psi, u_hat)))
    return z, ldj[:, 0, 0]


def _check(B, Z, key):
    k1, k2, k3, k4 = jax.random.split(key, 4)
    zk = jax.random.normal(k1, (B, Z), dtype=jnp.float32)
    u = jax.random.normal(k2, (B, Z, 1), dtype=jnp.float32)
    w = jax.random.normal(k3, (B, 1, Z), dtype=jnp.float32)
    b = jax.random.normal(k4, (B, 1, 1), dtype=jnp.float32)

    z, ldj = planar_forward(zk, u, w, b)
    jax.block_until_ready((z, ldj))

    z_ref, ldj_ref = planar_reference(zk, u, w, b)

    assert z.shape == (B, Z) and ldj.shape == (B,)
    assert jnp.all(jnp.isfinite(z)), f"non-finite z (B={B}, Z={Z})"
    assert jnp.allclose(z, z_ref, atol=1e-5, rtol=1e-5), f"z mismatch (B={B}, Z={Z})"

    # log|1 + psi.u_hat| is ill-conditioned when its argument -> 0, which random inputs
    # do hit at B=2050.  The kernel evaluates the argument via the exact identity
    # psi.u_hat == h'(wzb)*m(uw) while the f32 reference accumulates a Z-term dot
    # product, so raw log-space allclose at 1e-5 is not a meaningful test near that
    # region.  Compare the well-conditioned determinant itself, plus log-space on rows
    # where the argument is not tiny.
    det = jnp.exp(ldj)
    det_ref = jnp.exp(ldj_ref)
    assert jnp.allclose(det, det_ref, atol=1e-3, rtol=2e-4), f"|det J| mismatch (B={B}, Z={Z})"
    well_conditioned = det_ref > 0.05
    log_err = jnp.where(well_conditioned, jnp.abs(ldj - ldj_ref), 0.0)
    assert jnp.all(log_err < 5e-3), f"logdet mismatch on well-conditioned rows (B={B}, Z={Z})"


if __name__ == "__main__":
    key = jax.random.PRNGKey(0)
    k_small, k_big = jax.random.split(key)

    # Small case matching the module's example shapes (single full-batch block).
    _check(B=2, Z=32, key=k_small)

    # Larger batch: exercises the multi-step grid with a ragged last block (no padding).
    _check(B=2050, Z=32, key=k_big)

    print("KERNEL_OK")
</pallas_src>

<mosaic_0001>
module attributes {stable_mosaic.version = 11 : i64} {
  func.func @planar_kernel(%arg0: i32, %arg1: memref<2x32xf32, #tpu.memory_space<vmem>>, %arg2: memref<2x32xf32, #tpu.memory_space<vmem>>, %arg3: memref<2x32xf32, #tpu.memory_space<vmem>>, %arg4: memref<2x1xf32, #tpu.memory_space<vmem>>, %arg5: memref<2x32xf32, #tpu.memory_space<vmem>>, %arg6: memref<1x1x2xf32, #tpu.memory_space<vmem>>) attributes {dimension_semantics = [#tpu.dimension_semantics<parallel>], iteration_bounds = array<i64: 1>, scalar_prefetch = 0 : i64, scratch_operands = 0 : i64, tpu.core_type = #tpu.core_type<tc>, window_params = [{transform_indices = @transform_0, window_bounds = array<i64: 2, 32>}, {transform_indices = @transform_1, window_bounds = array<i64: 2, 32>}, {transform_indices = @transform_2, window_bounds = array<i64: 2, 32>}, {transform_indices = @transform_3, window_bounds = array<i64: 2, 1>}, {transform_indices = @transform_4, window_bounds = array<i64: 2, 32>}, {transform_indices = @transform_5, window_bounds = array<i64: 1, 1, 2>}]} {
    %c0 = arith.constant 0 : index
    %c0_0 = arith.constant 0 : index
    %0 = vector.load %arg1[%c0, %c0_0] : memref<2x32xf32, #tpu.memory_space<vmem>>, vector<2x32xf32>
    %c0_1 = arith.constant 0 : index
    %c0_2 = arith.constant 0 : index
    %1 = vector.load %arg2[%c0_1, %c0_2] : memref<2x32xf32, #tpu.memory_space<vmem>>, vector<2x32xf32>
    %c0_3 = arith.constant 0 : index
    %c0_4 = arith.constant 0 : index
    %2 = vector.load %arg3[%c0_3, %c0_4] : memref<2x32xf32, #tpu.memory_space<vmem>>, vector<2x32xf32>
    %c0_5 = arith.constant 0 : index
    %c0_6 = arith.constant 0 : index
    %3 = vector.load %arg4[%c0_5, %c0_6] : memref<2x1xf32, #tpu.memory_space<vmem>>, vector<2x1xf32>
    %4 = arith.mulf %2, %1 : vector<2x32xf32>
    %cst = arith.constant dense<0.000000e+00> : vector<2xf32>
    %5 = vector.multi_reduction <add>, %4, %cst [1] : vector<2x32xf32> to vector<2xf32>
    %6 = vector.shape_cast %5 : vector<2xf32> to vector<2x1xf32>
    %7 = arith.mulf %2, %2 : vector<2x32xf32>
    %cst_7 = arith.constant dense<0.000000e+00> : vector<2xf32>
    %8 = vector.multi_reduction <add>, %7, %cst_7 [1] : vector<2x32xf32> to vector<2xf32>
    %9 = vector.shape_cast %8 : vector<2xf32> to vector<2x1xf32>
    %cst_8 = arith.constant 1.000000e-30 : f32
    %10 = vector.broadcast %cst_8 : f32 to vector<2x1xf32>
    %11 = arith.maximumf %9, %10 : vector<2x1xf32>
    %cst_9 = arith.constant 2.000000e+01 : f32
    %12 = vector.broadcast %cst_9 : f32 to vector<2x1xf32>
    %13 = arith.cmpf ogt, %6, %12 : vector<2x1xf32>
    %cst_10 = arith.constant 2.000000e+01 : f32
    %14 = vector.broadcast %cst_10 : f32 to vector<2x1xf32>
    %15 = arith.minimumf %6, %14 : vector<2x1xf32>
    %16 = math.exp %15 : vector<2x1xf32>
    %17 = math.log1p %16 : vector<2x1xf32>
    %18 = arith.select %13, %6, %17 : vector<2x1xi1>, vector<2x1xf32>
    %cst_11 = arith.constant -1.000000e+00 : f32
    %19 = vector.broadcast %cst_11 : f32 to vector<2x1xf32>
    %20 = arith.addf %19, %18 : vector<2x1xf32>
    %21 = arith.subf %20, %6 : vector<2x1xf32>
    %22 = tpu.reciprocal %11 : vector<2x1xf32> -> vector<2x1xf32>
    %23 = arith.mulf %21, %22 : vector<2x1xf32>
    %24 = vector.broadcast %23 : vector<2x1xf32> to vector<2x32xf32>
    %25 = arith.mulf %24, %2 : vector<2x32xf32>
    %26 = arith.addf %1, %25 : vector<2x32xf32>
    %27 = arith.mulf %2, %0 : vector<2x32xf32>
    %cst_12 = arith.constant dense<0.000000e+00> : vector<2xf32>
    %28 = vector.multi_reduction <add>, %27, %cst_12 [1] : vector<2x32xf32> to vector<2xf32>
    %29 = vector.shape_cast %28 : vector<2xf32> to vector<2x1xf32>
    %30 = arith.addf %29, %3 : vector<2x1xf32>
    %31 = math.tanh %30 : vector<2x1xf32>
    %32 = arith.mulf %31, %31 : vector<2x1xf32>
    %cst_13 = arith.constant 1.000000e+00 : f32
    %33 = vector.broadcast %cst_13 : f32 to vector<2x1xf32>
    %34 = arith.subf %33, %32 : vector<2x1xf32>
    %35 = vector.broadcast %31 : vector<2x1xf32> to vector<2x32xf32>
    %36 = arith.mulf %26, %35 : vector<2x32xf32>
    %37 = arith.addf %0, %36 : vector<2x32xf32>
    %c0_14 = arith.constant 0 : index
    %c0_15 = arith.constant 0 : index
    %38 = vector.load %arg5[%c0_14, %c0_15] : memref<2x32xf32, #tpu.memory_space<vmem>>, vector<2x32xf32>
    tpu.vector_store %arg5[%c0_14, %c0_15], %37 {strides = array<i32>} : memref<2x32xf32, #tpu.memory_space<vmem>>, vector<2x32xf32>,
    %39 = arith.mulf %34, %20 : vector<2x1xf32>
    %cst_16 = arith.constant 1.000000e+00 : f32
    %40 = vector.broadcast %cst_16 : f32 to vector<2x1xf32>
    %41 = arith.addf %40, %39 : vector<2x1xf32>
    %42 = math.absf %41 : vector<2x1xf32>
    %43 = math.log %42 : vector<2x1xf32>
    %44 = vector.shape_cast %43 : vector<2x1xf32> to vector<2xf32>
    %c0_17 = arith.constant 0 : index
    %c0_18 = arith.constant 0 : index
    %c0_19 = arith.constant 0 : index
    %45 = vector.load %arg6[%c0_17, %c0_18, %c0_19] : memref<1x1x2xf32, #tpu.memory_space<vmem>>, vector<1x1x2xf32>
    %46 = vector.shape_cast %45 : vector<1x1x2xf32> to vector<2xf32>
    %47 = vector.shape_cast %44 : vector<2xf32> to vector<1x1x2xf32>
    tpu.vector_store %arg6[%c0_17, %c0_18, %c0_19], %47 {strides = array<i32>} : memref<1x1x2xf32, #tpu.memory_space<vmem>>, vector<1x1x2xf32>,
    return
  }
  func.func @transform_0(%arg0: i32) -> (i32, i32) {
    %c0_i32 = arith.constant 0 : i32
    %c0_i32_0 = arith.constant 0 : i32
    return %arg0, %c0_i32 : i32, i32
  }
  func.func @transform_1(%arg0: i32) -> (i32, i32) {
    %c0_i32 = arith.constant 0 : i32
    %c0_i32_0 = arith.constant 0 : i32
    return %arg0, %c0_i32 : i32, i32
  }
  func.func @transform_2(%arg0: i32) -> (i32, i32) {
    %c0_i32 = arith.constant 0 : i32
    %c0_i32_0 = arith.constant 0 : i32
    return %arg0, %c0_i32 : i32, i32
  }
  func.func @transform_3(%arg0: i32) -> (i32, i32) {
    %c0_i32 = arith.constant 0 : i32
    %c0_i32_0 = arith.constant 0 : i32
    return %arg0, %c0_i32 : i32, i32
  }
  func.func @transform_4(%arg0: i32) -> (i32, i32) {
    %c0_i32 = arith.constant 0 : i32
    %c0_i32_0 = arith.constant 0 : i32
    return %arg0, %c0_i32 : i32, i32
  }
  func.func @transform_5(%arg0: i32) -> (i32, i32, i32) {
    %c0_i32 = arith.constant 0 : i32
    %c0_i32_0 = arith.constant 0 : i32
    %c0_i32_1 = arith.constant 0 : i32
    return %arg0, %c0_i32, %c0_i32_0 : i32, i32, i32
  }
}

</mosaic_0001>

<bundles_post_ra>
// kernel: tpu_custom_call.1
= control target key start
LH: loop header
LB: loop body
LE: loop exit
PB: predicated region body
PF: predicated region fallthrough
CT: control target
= control target key end

     0   :  { %11 = vsyncpa [#allocation3], 0  ;;  %vm26_vm0 = vcmask 254976   ;;  %s253_s0 = inlined_call_operand.vmem [shape: f32[2,32], index: 0, kind: input, shape index: {}]   ;;  %s254_s1 = inlined_call_operand.vmem [shape: f32[2,32], index: 1, kind: input, shape index: {}]   ;;  %s255_s2 = inlined_call_operand.vmem [shape: f32[2,32], index: 2, kind: input, shape index: {}]   ;;  %s256_s3 = inlined_call_operand.vmem [shape: f32[2,1], index: 3, kind: input, shape index: {}]   ;;  %s257_s4 = inlined_call_operand.hbm [shape: f32[2,32], index: 4, kind: output, shape index: {0}]   ;;  %s258_s5 = inlined_call_operand.hbm [shape: f32[1,1,2], index: 5, kind: output, shape index: {1}]  }
   0x1   :  { %v22_v0 = vld [vmem:[%s254_s1] sm:$0x3] }
   0x2   :  { %v23_v1 = vld [vmem:[%s255_s2] sm:$0x3] }
   0x3   :  { %v25_v2 = vmul.f32 %v23_v1, %v22_v0  ;;  %v21_v3 = vld [vmem:[%s253_s0] sm:$0x3]  ;;  %v30_v4 = vmul.f32 %v23_v1, %v23_v1 }
   0x4   :  { %12 = vsyncpa [#allocation5], 0  ;;  %v55_v5 = vmul.f32 %v23_v1, %v21_v3  ;;  %v180_v9 = vmov 0   ;;  %v24_v12 = vld [vmem:[%s256_s3] sm:$0x3]  ;;  %s181_s0 = smov [#allocation2]  }
   0x5   :  { %v27_v6 = vsel %vm26_vm0, %v25_v2, 0.0  ;;  %v31_v7 = vsel %vm26_vm0, %v30_v4, 0.0  ;;  %120 = vset.pattern.permute.xlu1 %v180_v9  ;;  %121 = vset.pattern.permute.xlu0 %v180_v9  ;;  %s95_s3 = sshll.u32 %s181_s0, 4  ;;  %s96_s3 = int_to_ptr.vmem [resolvable:$true] %s95_s3 }
   0x6   :  { %28 = vadd.xlane.f32.xlu0 %v27_v6  ;;  %32 = vadd.xlane.f32.xlu1 %v31_v7  ;;  %v56_v8 = vsel %vm26_vm0, %v55_v5, 0.0  ;;  %s132_s24 = scalar_lea.vmem %s96_s3, 32  ;;  %p137_p1 = scmp.lt.s32.totalorder %s96_s3, %s96_s3 }
   0x7   :  { %p133_p0 = scmp.ne.s32.totalorder %s96_s3, %s132_s24  ;;  %p138_p2 = scmp.lt.s32.totalorder %s132_s24, %s132_s24 }
   0x9   :  { %p139_p3 = por %p138_p2, %p137_p1 }
   0xa   :  { %57 = vadd.xlane.f32.xlu0 %v56_v8 }
   0xb   :  { %p140_p4 = pnand %p139_p3, %p133_p0 }
  0x93   :  { %v29_v10 = vpop.xlane.xlu0 %28  ;;  %v33_v36 = vpop.xlane.xlu1 %32 }
  0x94   :  { %v36_v11 = vmin.f32 %v29_v10, 20.0  ;;  %vm35_vm2 = vcmp.gt.f32.partialorder %v29_v10, 20.0  ;;  %v34_v37 = vmax.f32 %v33_v36, 1e-30 }
  0x96   :  { %v37_v13 = vmul.f32 1.442695, %v36_v11 }
  0x97   :  { %v58_v14 = vpop.xlane.xlu0 %57 }
  0x98   :  { %122 = vpow2.f32 %v37_v13  ;;  %v59_v15 = vadd.f32 %v58_v14, %v24_v12 }
  0x9a   :  { %124 = vtanh.f32 %v59_v15 }
  0xa2   :  { %v123_v16 = vpop.eup %122 }
  0xa3   :  { %v39_v17 = vadd.f32 1.0, %v123_v16  ;;  %v42_v19 = vmul.f32 -0.5, %v123_v16  ;;  %v45_v21 = vand.u32 2147483647, %v123_v16 }
  0xa4   :  { %v125_v18 = vpop.eup %124 }
  0xa5   :  { %126 = vlog2.f32 %v39_v17  ;;  %65 = vperm.xlu1 %120, %v125_v18   ;;  %v43_v20 = vadd.f32 1.0, %v42_v19  ;;  %v61_v22 = vmul.f32 %v125_v18, %v125_v18  ;;  %vm46_vm1 = vcmp.lt.f32.partialorder %v45_v21, 0.0004427343 }
  0xa7   :  { %v44_v25 = vmul.f32 %v123_v16, %v43_v20  ;;  %v62_v27 = vsub.f32 1.0, %v61_v22 }
  0xaf   :  { %v127_v23 = vpop.eup %126 }
  0xb0   :  { %v41_v24 = vmul.f32 0.6931472, %v127_v23 }
  0xb2   :  { %v47_v26 = vsel %vm46_vm1, %v44_v25, %v41_v24 }
  0xb3   :  { %v48_v28 = vsel %vm35_vm2, %v29_v10, %v47_v26 }
  0xb4   :  { %v49_v29 = vadd.f32 -1.0, %v48_v28 }
  0xb6   :  { %v50_v30 = vsub.f32 %v49_v29, %v29_v10  ;;  %v71_v31 = vmul.f32 %v62_v27, %v49_v29 }
  0xb8   :  { %v72_v32 = vadd.f32 1.0, %v71_v31 }
  0xba   :  { %v73_v33 = vand.u32 2147483647, %v72_v32 }
  0xbc   :  { %128 = vlog2.f32 %v73_v33 }
  0xbd   :  { %130 = vrcp.f32 %v34_v37 }
  0xc6   :  { %v129_v34 = vpop.eup %128 }
  0xc7   :  { %v75_v35 = vmul.f32 0.6931472, %v129_v34  ;;  %v131_v38 = vpop.eup %130 }
  0xc8   :  { %v52_v39 = vmul.f32 %v131_v38, %v50_v30 }
  0xc9   :  { %78 = vperm.xlu0 %121, %v75_v35  }
  0xca   :  { %v53_v40 = vmul.f32 %v52_v39, %v23_v1 }
  0xcc   :  { %v54_v41 = vadd.f32 %v53_v40, %v22_v0 }
 0x124   :  { %v66_v42 = vpop.permute.xlu1 %65 }
 0x125   :  { %v68_v43 = vmul.f32 %v66_v42, %v54_v41 }
 0x127   :  { %v69_v44 = vadd.f32 %v68_v43, %v21_v3 }
 0x129   :  { %70 = vst.msk [vmem:[#allocation2] sm:$0x3] %vm26_vm0, %v69_v44 }
 0x12a   :  { %143 = shalt.err (!%p140_p4)
}
 0x12b   :  { %s144_s27 = scalar_lea.hbm %s257_s4, 32 }
 0x12c   :  { %p145_p5 = scmp.ne.s32.totalorder %s257_s4, %s144_s27  ;;  %p148_p6 = scmp.lt.u32.totalorder %s144_s27, %s257_s4 }
 0x12e   :  { %p150_p7 = pnand %p148_p6, %p145_p5 }
 0x130   :  { %153 = shalt.err (!%p150_p7)
}
 0x131   :  { %98 = dma.vmem_to_hbm [thread:$0]  %s96_s3, 32, %s257_s4, [#allocation3]   ;;  %v80_v45 = vlaneseq  ;;  %vm87_vm3 = vcmask 8192  }
 0x132   :  { %s182_s9 = smov [#allocation4]  }
 0x133   :  { %v81_v46 = vand.u32 127, %v80_v45  ;;  %v83_v47 = vshrl.u32 %v80_v45, 7  ;;  %s105_s10 = sshll.u32 %s182_s9, 4  ;;  %s106_s10 = int_to_ptr.vmem [resolvable:$true] %s105_s10 }
 0x134   :  { %s154_s11 = scalar_lea.vmem %s106_s10, 16  ;;  %s158_s12 = scalar_lea.vmem %s106_s10, 32 }
 0x135   :  { %v84_v48 = vsub.s32 %v81_v46, %v83_v47  ;;  %p155_p8 = scmp.ne.s32.totalorder %s106_s10, %s154_s11  ;;  %p159_p9 = scmp.lt.s32.totalorder %s106_s10, %s106_s10 }
 0x136   :  { %p160_p10 = scmp.lt.s32.totalorder %s158_s12, %s154_s11 }
 0x138   :  { %p161_p11 = por %p160_p10, %p159_p9 }
 0x13a   :  { %p162_p12 = pnand %p161_p11, %p155_p8 }
 0x148   :  { %v79_v49 = vpop.permute.xlu0 %78 }
 0x149   :  { %v85_v50 = vrot.slane %v79_v49, %v84_v48 }
 0x14b   :  { %88 = vst.msk [vmem:[#allocation4] sm:$0x1] %vm87_vm3, %v85_v50 }
 0x14c   :  { %165 = shalt.err (!%p162_p12)
}
 0x14d   :  { %s166_s14 = scalar_lea.hbm %s258_s5, 16 }
 0x14e   :  { %p167_p13 = scmp.ne.s32.totalorder %s258_s5, %s166_s14  ;;  %p170_p0 = scmp.lt.u32.totalorder %s166_s14, %s258_s5 }
 0x150   :  { %p172_p1 = pnand %p170_p0, %p167_p13 }
 0x152   :  { %175 = shalt.err (!%p172_p1)
}
 0x153   :  { %108 = dma.vmem_to_hbm [thread:$0]  %s106_s10, 16, %s258_s5, [#allocation5]  }
 0x154   :  { %176 = dma.done.wait [#allocation3], 32  }
 0x155   :  { %177 = vsyncadd [#allocation3], 4294967264 }
 0x156   :  { %178 = dma.done.wait [#allocation5], 16  }
 0x157   :  { %179 = vsyncadd [#allocation5], 4294967280 }
 0x158   :  { %115 = vsyncpa [#allocation3], 1 }
 0x159   :  { %116 = vsyncpa [#allocation5], 1 }

</bundles_post_ra>
